<compile_context>
chip_gen: v7x
topology: tpu7x:2x2x1
jax: 0.10.0
libtpu: 0.0.40
codegen_flags: <defaults>
</compile_context>

<pallas_src>
import functools

import jax
import jax.numpy as jnp
from jax.experimental import pallas as pl
from jax.experimental.pallas import tpu as pltpu

_LANES = 128


def _round_up(x: int, m: int) -> int:
    return -(-x // m) * m


# ---------------------------------------------------------------------------
# Kernel
# ---------------------------------------------------------------------------
def _shared_model_kernel(obs_ref, params_ref, out_ref, *,
                         obs_dim, hidden, num_actions, out_w, offs):
    o_w1, o_b1, o_w2, o_b2, o_wh, o_bh = offs
    A = num_actions

    # Static, tile-aligned views into the packed parameter slab.
    w1 = params_ref[o_w1:o_w1 + obs_dim, 0:hidden]      # [obs_dim, hidden]
    b1 = params_ref[o_b1:o_b1 + 1, 0:hidden]            # [1, hidden]
    w2 = params_ref[o_w2:o_w2 + hidden, 0:hidden]        # [hidden, hidden]
    b2 = params_ref[o_b2:o_b2 + 1, 0:hidden]            # [1, hidden]
    wh = params_ref[o_wh:o_wh + hidden, 0:A + 1]          # fused actor|critic
    bh = params_ref[o_bh:o_bh + 1, 0:A + 1]

    obs = obs_ref[...]

    # Shared trunk: tanh(obs @ W1 + b1) -> tanh(h @ W2 + b2)
    h = jnp.tanh(jnp.dot(obs, w1, preferred_element_type=jnp.float32) + b1)
    h = jnp.tanh(jnp.dot(h, w2, preferred_element_type=jnp.float32) + b2)

    # Fused heads: single matmul, then split columns. Value is sliced off
    # BEFORE the softmax so log-softmax is over exactly A action lanes.
    heads = jnp.dot(h, wh, preferred_element_type=jnp.float32) + bh  # [T, A+1]
    logits = heads[:, 0:A]
    value = heads[:, A:A + 1]

    # Categorical(logits=...) normalizes internally -> reproduce log_softmax.
    m = jnp.max(logits, axis=-1, keepdims=True)
    lse = m + jnp.log(jnp.sum(jnp.exp(logits - m), axis=-1, keepdims=True))
    logp = logits - lse

    # One lane-dense output slab: [logits | logp | value | zero pad] -> 1 store.
    pieces = [logits, logp, value]
    pad_w = out_w - (2 * A + 1)
    if pad_w > 0:
        pieces.append(jnp.zeros((logits.shape[0], pad_w), jnp.float32))
    out_ref[...] = jnp.concatenate(pieces, axis=-1)


# ---------------------------------------------------------------------------
# Wrapper
# ---------------------------------------------------------------------------
def _pack_params(blocks):
    """Pad each [r, c] param to [round_up(r,8), 128] and stack along rows."""
    padded, offsets, off = [], [], 0
    for x in blocks:
        r, c = x.shape
        assert c <= _LANES, "parameter lane width must fit in 128 lanes"
        rp = _round_up(r, 8)
        padded.append(jnp.pad(x.astype(jnp.float32),
                              ((0, rp - r), (0, _LANES - c))))
        offsets.append(off)
        off += rp
    return jnp.concatenate(padded, axis=0), tuple(offsets)


@functools.partial(jax.jit, static_argnames=("tile_b",))
def shared_model_forward(obs, params, tile_b=256):
    """SharedModel forward pass in one Pallas kernel.

    Returns (logits, log_probs, value); log_probs are the normalized logits of
    the Categorical action distribution.
    """
    obs = obs.astype(jnp.float32)
    B, obs_dim = obs.shape
    hidden = params["w1"].shape[1]
    A = params["wa"].shape[1]

    # Fuse actor/critic heads into one [hidden, A+1] weight + [1, A+1] bias.
    wh = jnp.concatenate([params["wa"], params["wc"]], axis=1)
    bh = jnp.concatenate([params["ba"], params["bc"]], axis=1)

    params_slab, offs = _pack_params(
        [params["w1"], params["b1"], params["w2"], params["b2"], wh, bh])

    # Batch tiling: 256-row tiles for big PPO batches, one padded tile otherwise.
    tile = min(tile_b, _round_up(B, 8))
    b_pad = _round_up(B, tile)
    obs_p = jnp.pad(obs, ((0, b_pad - B), (0, 0)))

    out_w = _round_up(max(2 * A + 1, _LANES), _LANES)

    kernel = functools.partial(
        _shared_model_kernel,
        obs_dim=obs_dim, hidden=hidden, num_actions=A, out_w=out_w, offs=offs)

    cost = pl.CostEstimate(
        flops=2 * b_pad * (obs_dim * hidden + hidden * hidden + hidden * (A + 1)),
        transcendentals=b_pad * (2 * hidden + A + 1),
        bytes_accessed=(obs_p.size + params_slab.size + b_pad * out_w) * 4,
    )

    out = pl.pallas_call(
        kernel,
        out_shape=jax.ShapeDtypeStruct((b_pad, out_w), jnp.float32),
        grid=(b_pad // tile,),
        in_specs=[
            pl.BlockSpec((tile, obs_dim), lambda i: (i, 0)),          # obs tiles
            pl.BlockSpec(params_slab.shape, lambda i: (0, 0)),        # resident
        ],
        out_specs=pl.BlockSpec((tile, out_w), lambda i: (i, 0)),
        compiler_params=pltpu.CompilerParams(
            dimension_semantics=("parallel",)),
        cost_estimate=cost,
    )(obs_p, params_slab)

    logits = out[:B, 0:A]
    log_probs = out[:B, A:2 * A]
    value = out[:B, 2 * A:2 * A + 1]
    return logits, log_probs, value


# ---------------------------------------------------------------------------
# Deterministic parameter init (orthogonal, like layer_init in the PyTorch code)
# ---------------------------------------------------------------------------
def _orthogonal(key, in_dim, out_dim, gain):
    n = max(in_dim, out_dim)
    a = jax.random.normal(key, (n, n), dtype=jnp.float32)
    q, r = jnp.linalg.qr(a)
    q = q * jnp.sign(jnp.diag(r))[None, :]
    return gain * q[:in_dim, :out_dim]  # stored as [in, out] (transposed vs torch)


def init_params(key, obs_dim, action_dim, hidden=64):
    k1, k2, k3, k4 = jax.random.split(key, 4)
    sqrt2 = float(jnp.sqrt(2.0))
    return {
        "w1": _orthogonal(k1, obs_dim, hidden, sqrt2),
        "b1": jnp.zeros((1, hidden), jnp.float32),
        "w2": _orthogonal(k2, hidden, hidden, sqrt2),
        "b2": jnp.zeros((1, hidden), jnp.float32),
        "wa": _orthogonal(k3, hidden, action_dim, 0.01),
        "ba": jnp.zeros((1, action_dim), jnp.float32),
        "wc": _orthogonal(k4, hidden, 1, 1.0),
        "bc": jnp.zeros((1, 1), jnp.float32),
    }


# TODO(synk): torch.distributions.Categorical is a Python-side distribution
# object; the kernel returns its parameterization (raw + normalized logits)
# instead of the object itself.


def _reference_forward(obs, params):
    h = jnp.tanh(obs @ params["w1"] + params["b1"])
    h = jnp.tanh(h @ params["w2"] + params["b2"])
    logits = h @ params["wa"] + params["ba"]
    logp = jax.nn.log_softmax(logits, axis=-1)
    value = h @ params["wc"] + params["bc"]
    return logits, logp, value


if __name__ == "__main__":
    key = jax.random.PRNGKey(0)
    k_obs, k_param = jax.random.split(key)

    batch, obs_dim, action_dim = 8, 16, 6
    obs = jax.random.normal(k_obs, (batch, obs_dim), dtype=jnp.float32)
    params = init_params(k_param, obs_dim, action_dim)

    logits, log_probs, value = shared_model_forward(obs, params)
    jax.block_until_ready((logits, log_probs, value))

    # sanity check against the pure-JAX reference
    ref_logits, ref_logp, ref_value = _reference_forward(obs, params)
    assert jnp.allclose(logits, ref_logits, atol=1e-5)
    assert jnp.allclose(log_probs, ref_logp, atol=1e-5)
    assert jnp.allclose(value, ref_value, atol=1e-5)

    print("KERNEL_OK")
</pallas_src>

<mosaic_0001>
module attributes {stable_mosaic.version = 11 : i64} {
  func.func @_shared_model_kernel(%arg0: i32, %arg1: memref<8x16xf32, #tpu.memory_space<vmem>>, %arg2: memref<168x128xf32, #tpu.memory_space<vmem>>, %arg3: memref<8x128xf32, #tpu.memory_space<vmem>>) attributes {dimension_semantics = [#tpu.dimension_semantics<parallel>], iteration_bounds = array<i64: 1>, scalar_prefetch = 0 : i64, scratch_operands = 0 : i64, tpu.core_type = #tpu.core_type<tc>, window_params = [{transform_indices = @transform_0, window_bounds = array<i64: 8, 16>}, {pipeline_mode = #tpu.pipeline_mode<synchronous>, transform_indices = @transform_1, window_bounds = array<i64: 168, 128>}, {transform_indices = @transform_2, window_bounds = array<i64: 8, 128>}]} {
    %c0 = arith.constant 0 : index
    %c0_0 = arith.constant 0 : index
    %0 = vector.load %arg2[%c0, %c0_0] : memref<168x128xf32, #tpu.memory_space<vmem>>, vector<16x64xf32>
    %c16 = arith.constant 16 : index
    %c0_1 = arith.constant 0 : index
    %1 = vector.load %arg2[%c16, %c0_1] : memref<168x128xf32, #tpu.memory_space<vmem>>, vector<1x64xf32>
    %c24 = arith.constant 24 : index
    %c0_2 = arith.constant 0 : index
    %2 = vector.load %arg2[%c24, %c0_2] : memref<168x128xf32, #tpu.memory_space<vmem>>, vector<64x64xf32>
    %c88 = arith.constant 88 : index
    %c0_3 = arith.constant 0 : index
    %3 = vector.load %arg2[%c88, %c0_3] : memref<168x128xf32, #tpu.memory_space<vmem>>, vector<1x64xf32>
    %c96 = arith.constant 96 : index
    %c0_4 = arith.constant 0 : index
    %4 = vector.load %arg2[%c96, %c0_4] : memref<168x128xf32, #tpu.memory_space<vmem>>, vector<64x7xf32>
    %c160 = arith.constant 160 : index
    %c0_5 = arith.constant 0 : index
    %5 = vector.load %arg2[%c160, %c0_5] : memref<168x128xf32, #tpu.memory_space<vmem>>, vector<1x7xf32>
    %c0_6 = arith.constant 0 : index
    %c0_7 = arith.constant 0 : index
    %6 = vector.load %arg1[%c0_6, %c0_7] : memref<8x16xf32, #tpu.memory_space<vmem>>, vector<8x16xf32>
    %cst = arith.constant dense<0.000000e+00> : vector<8x64xf32>
    %7 = tpu.matmul %6, %0, %cst {dimension_numbers = #tpu.dot_dimension_numbers<[1], [0], [0], [1], [0, 0, 1, 1], [], []>} : vector<8x16xf32>, vector<16x64xf32>, vector<8x64xf32> -> vector<8x64xf32>
    %8 = vector.broadcast %1 : vector<1x64xf32> to vector<8x64xf32>
    %9 = arith.addf %7, %8 : vector<8x64xf32>
    %10 = math.tanh %9 : vector<8x64xf32>
    %cst_8 = arith.constant dense<0.000000e+00> : vector<8x64xf32>
    %11 = tpu.matmul %10, %2, %cst_8 {dimension_numbers = #tpu.dot_dimension_numbers<[1], [0], [0], [1], [0, 0, 1, 1], [], []>} : vector<8x64xf32>, vector<64x64xf32>, vector<8x64xf32> -> vector<8x64xf32>
    %12 = vector.broadcast %3 : vector<1x64xf32> to vector<8x64xf32>
    %13 = arith.addf %11, %12 : vector<8x64xf32>
    %14 = math.tanh %13 : vector<8x64xf32>
    %cst_9 = arith.constant dense<0.000000e+00> : vector<8x7xf32>
    %15 = tpu.matmul %14, %4, %cst_9 {dimension_numbers = #tpu.dot_dimension_numbers<[1], [0], [0], [1], [0, 0, 1, 1], [], []>} : vector<8x64xf32>, vector<64x7xf32>, vector<8x7xf32> -> vector<8x7xf32>
    %16 = vector.broadcast %5 : vector<1x7xf32> to vector<8x7xf32>
    %17 = arith.addf %15, %16 : vector<8x7xf32>
    %18 = vector.extract_strided_slice %17 {offsets = [0, 0], sizes = [8, 6], strides = [1, 1]} : vector<8x7xf32> to vector<8x6xf32>
    %19 = vector.extract_strided_slice %17 {offsets = [0, 6], sizes = [8, 1], strides = [1, 1]} : vector<8x7xf32> to vector<8x1xf32>
    %cst_10 = arith.constant dense<0xFF800000> : vector<8xf32>
    %20 = vector.multi_reduction <maximumf>, %18, %cst_10 [1] : vector<8x6xf32> to vector<8xf32>
    %21 = vector.shape_cast %20 : vector<8xf32> to vector<8x1xf32>
    %22 = vector.broadcast %21 : vector<8x1xf32> to vector<8x6xf32>
    %23 = arith.subf %18, %22 : vector<8x6xf32>
    %24 = math.exp %23 : vector<8x6xf32>
    %cst_11 = arith.constant dense<0.000000e+00> : vector<8xf32>
    %25 = vector.multi_reduction <add>, %24, %cst_11 [1] : vector<8x6xf32> to vector<8xf32>
    %26 = vector.shape_cast %25 : vector<8xf32> to vector<8x1xf32>
    %27 = math.log %26 : vector<8x1xf32>
    %28 = arith.addf %21, %27 : vector<8x1xf32>
    %29 = vector.broadcast %28 : vector<8x1xf32> to vector<8x6xf32>
    %30 = arith.subf %18, %29 : vector<8x6xf32>
    %cst_12 = arith.constant 0.000000e+00 : f32
    %31 = vector.broadcast %cst_12 : f32 to vector<8x115xf32>
    %32 = tpu.concatenate %18, %30, %19, %31 in 1 : vector<8x6xf32>, vector<8x6xf32>, vector<8x1xf32>, vector<8x115xf32> -> vector<8x128xf32>
    %c0_13 = arith.constant 0 : index
    %c0_14 = arith.constant 0 : index
    %33 = vector.load %arg3[%c0_13, %c0_14] : memref<8x128xf32, #tpu.memory_space<vmem>>, vector<8x128xf32>
    tpu.vector_store %arg3[%c0_13, %c0_14], %32 {strides = array<i32>} : memref<8x128xf32, #tpu.memory_space<vmem>>, vector<8x128xf32>,
    return
  }
  func.func @transform_0(%arg0: i32) -> (i32, i32) {
    %c0_i32 = arith.constant 0 : i32
    %c0_i32_0 = arith.constant 0 : i32
    return %arg0, %c0_i32 : i32, i32
  }
  func.func @transform_1(%arg0: i32) -> (i32, i32) {
    %c0_i32 = arith.constant 0 : i32
    %c0_i32_0 = arith.constant 0 : i32
    %c0_i32_1 = arith.constant 0 : i32
    return %c0_i32, %c0_i32_0 : i32, i32
  }
  func.func @transform_2(%arg0: i32) -> (i32, i32) {
    %c0_i32 = arith.constant 0 : i32
    %c0_i32_0 = arith.constant 0 : i32
    return %arg0, %c0_i32 : i32, i32
  }
}

</mosaic_0001>

<bundles_post_ra>
// kernel: shared_model_forward.1
= control target key start
LH: loop header
LB: loop body
LE: loop exit
PB: predicated region body
PF: predicated region fallthrough
CT: control target
= control target key end

     0   :  { %v411_v0 = vmov 0.0|0.0   ;;  %vm412_vm0 = vmmov 0   ;;  %v413_v3 = vmov 0.0   ;;  %vm37_vm1 = vcmask 130048   ;;  %s507_s1 = inlined_call_operand.vmem [shape: f32[168,128], index: 1, kind: input, shape index: {}]   ;;  %s508_s0 = inlined_call_operand.vmem [shape: f32[8,16], index: 0, kind: input, shape index: {}]   ;;  %s509_s2 = inlined_call_operand.vmem [shape: f32[8,128], index: 2, kind: output, shape index: {}]  }
   0x1   :  { %372 = vmatprep.subr.bf16.mxu0 %v411_v0  ;;  %v11_v1 = vld [vmem:[%s507_s1] sm:$0xff]  ;;  %v12_v2 = vld [vmem:[%s507_s1 + $0x8] sm:$0xff]  ;;  %331 = vmatprep.mubr.msk.f32.mxu0 %vm412_vm0, %v413_v3  ;;  %v14_v5 = vld [vmem:[%s507_s1 + $0x18] sm:$0xff]  ;;  %vm116_vm2 = vcmask 523264   ;;  %vm268_vm3 = vcmask 48128   ;;  %vm291_vm4 = vcmask 97280  }
   0x2   :  { %v373_v4 = vpack.c.bf16 %v12_v2, %v11_v1  ;;  %375 = vmatprep.subr.bf16.mxu1 %v411_v0  ;;  %v15_v6 = vld [vmem:[%s507_s1 + $0x20] sm:$0xff]  ;;  %350 = vmatprep.mubr.msk.f32.mxu1 %vm412_vm0, %v413_v3  ;;  %v16_v9 = vld [vmem:[%s507_s1 + $0x28] sm:$0xff]  ;;  %v17_v10 = vld [vmem:[%s507_s1 + $0x30] sm:$0xff]  ;;  %vm293_vm5 = vcmask 105472  }
   0x3   :  { %v376_v7 = vpack.c.bf16 %v15_v6, %v14_v5  ;;  %v32_v8 = vld [vmem:[%s508_s0] sm:$0xff]  ;;  %v379_v11 = vpack.c.bf16 %v17_v10, %v16_v9  ;;  %v18_v12 = vld [vmem:[%s507_s1 + $0x38] sm:$0xff]  ;;  %v20_v15 = vld [vmem:[%s507_s1 + $0x48] sm:$0xff] }
   0x4   :  { %374 = vmatpush3.bf16.msra.mxu0 %v373_v4  ;;  %v19_v13 = vld [vmem:[%s507_s1 + $0x40] sm:$0xff]  ;;  %v21_v16 = vld [vmem:[%s507_s1 + $0x50] sm:$0xff]  ;;  %v24_v19 = vld [vmem:[%s507_s1 + $0x68] sm:$0xff] }
   0x5   :  { %377 = vmatpush3.bf16.msra.mxu1 %v376_v7  ;;  %387 = vmatprep.subr.bf16.mxu0 %v411_v0  ;;  %v382_v14 = vpack.c.bf16 %v19_v13, %v18_v12  ;;  %v385_v17 = vpack.c.bf16 %v21_v16, %v20_v15  ;;  %v23_v18 = vld [vmem:[%s507_s1 + $0x60] sm:$0xff]  ;;  %v300_v21 = vld [vmem:[%s507_s1 + $0x10] ss:$0 sm:$0xff]  ;;  %v26_v27 = vld [vmem:[%s507_s1 + $0x78] sm:$0xff] }
   0x6   :  { %378 = vmatprep.subr.bf16.mxu1 %v411_v0  ;;  %v388_v20 = vpack.c.bf16 %v24_v19, %v23_v18  ;;  %v25_v26 = vld [vmem:[%s507_s1 + $0x70] sm:$0xff]  ;;  %v27_v29 = vld [vmem:[%s507_s1 + $0x80] sm:$0xff]  ;;  %v28_v30 = vld [vmem:[%s507_s1 + $0x88] sm:$0xff] }
   0x7   :  { %332 = vmatmul.mubr.msk.f32.vlgmr.msra.gmra.mrb[0].mxu0 %vm37_vm1, %v32_v8  ;;  %v391_v28 = vpack.c.bf16 %v26_v27, %v25_v26  ;;  %v394_v31 = vpack.c.bf16 %v28_v30, %v27_v29  ;;  %v29_v32 = vld [vmem:[%s507_s1 + $0x90] sm:$0xff]  ;;  %v30_v33 = vld [vmem:[%s507_s1 + $0x98] sm:$0xff]  ;;  %v304_v40 = vld [vmem:[%s507_s1 + $0xa0] ss:$0 sm:$0xff] }
   0x8   :  { %369 = vmatprep.mubr.msk.f32.mxu0 %vm412_vm0, %v413_v3  ;;  %389 = vmatpush3.bf16.msra.mxu0 %v388_v20  ;;  %v397_v34 = vpack.c.bf16 %v30_v33, %v29_v32  ;;  %v302_v35 = vld [vmem:[%s507_s1 + $0x58] ss:$0 sm:$0xff]  ;;  %s414_s1 = smov 6  }
   0x9   :  { %380 = vmatpush3.bf16.msra.mxu1 %v379_v11  ;;  %390 = vmatprep.subr.bf16.mxu0 %v411_v0 }
   0xa   :  { %381 = vmatprep.subr.bf16.mxu1 %v411_v0 }
   0xc   :  { %392 = vmatpush3.bf16.msra.mxu0 %v391_v28 }
   0xd   :  { %383 = vmatpush3.bf16.msra.mxu1 %v382_v14  ;;  %393 = vmatprep.subr.bf16.mxu0 %v411_v0 }
   0xe   :  { %384 = vmatprep.subr.bf16.mxu1 %v411_v0 }
  0x10   :  { %395 = vmatpush3.bf16.msra.mxu0 %v394_v31 }
  0x11   :  { %386 = vmatpush3.bf16.msra.mxu1 %v385_v17  ;;  %396 = vmatprep.subr.bf16.mxu0 %v411_v0 }
  0x14   :  { %398 = vmatpush3.bf16.msra.mxu0 %v397_v34 }
  0xda   :  { %v107_v22 = vpop.f32.mrb[0].mxu0 }
  0xdb   :  { %v108_v23 = vadd.f32 %v300_v21, %v107_v22  ;;  %v333_v24 = vpop.f32.mrb[1].mxu0 }
  0xdd   :  { %403 = vtanh.f32 %v108_v23 }
  0xe7   :  { %v404_v25 = vpop.eup %403 }
  0xe8   :  { %351 = vmatmul.mubr.msk.f32.vlgmr.msra.gmra.mrb[0].mxu1 %vm116_vm2, %v404_v25 }
 0x1bb   :  { %v186_v36 = vpop.f32.mrb[0].mxu1 }
 0x1bc   :  { %v187_v37 = vadd.f32 %v302_v35, %v186_v36  ;;  %v352_v38 = vpop.f32.mrb[1].mxu1 }
 0x1be   :  { %405 = vtanh.f32 %v187_v37 }
 0x1c8   :  { %v406_v39 = vpop.eup %405 }
 0x1c9   :  { %370 = vmatmul.mubr.msk.f32.vlgmr.msra.gmra.mrb[2].mxu0 %vm116_vm2, %v406_v39 }
 0x29c   :  { %v264_v41 = vpop.f32.mrb[2].mxu0 }
 0x29d   :  { %v265_v42 = vadd.f32 %v304_v40, %v264_v41  ;;  %v371_v43 = vpop.f32.mrb[3].mxu0 }
 0x29f   :  { %v269_v44 = vsel %vm268_vm3, %v265_v42, -inf }
 0x2a0   :  { %270 = vmax.xlane.f32.xlu0 %v269_v44 }
 0x32d   :  { %v271_v45 = vpop.xlane.xlu0 %270 }
 0x32e   :  { %v272_v46 = vsub.f32 %v265_v42, %v271_v45 }
 0x330   :  { %v273_v47 = vmul.f32 1.442695, %v272_v46 }
 0x332   :  { %407 = vpow2.f32 %v273_v47 }
 0x33c   :  { %v408_v48 = vpop.eup %407 }
 0x33d   :  { %v275_v49 = vsel %vm268_vm3, %v408_v48, 0.0 }
 0x33e   :  { %276 = vadd.xlane.f32.xlu0 %v275_v49 }
 0x3cb   :  { %v277_v50 = vpop.xlane.xlu0 %276 }
 0x3cc   :  { %409 = vlog2.f32 %v277_v50 }
 0x3d6   :  { %v410_v51 = vpop.eup %409 }
 0x3d7   :  { %v279_v52 = vmul.f32 0.6931472, %v410_v51 }
 0x3d9   :  { %v280_v53 = vadd.f32 %v279_v52, %v271_v45 }
 0x3db   :  { %v281_v54 = vsub.f32 %v265_v42, %v280_v53 }
 0x3dd   :  { %283 = vrot.lane.b32.xlu1 %v281_v54, %s414_s1 }
 0x3e1   :  { %287 = vrot.lane.b32.xlu1 %v265_v42, %s414_s1 }
 0x44f   :  { %v284_v55 = vpop.permute.xlu1 %283 }
 0x450   :  { %v290_v56 = vsel %vm268_vm3, %v265_v42, %v284_v55 }
 0x453   :  { %v288_v57 = vpop.permute.xlu1 %287 }
 0x454   :  { %v292_v58 = vsel %vm291_vm4, %v290_v56, %v288_v57 }
 0x455   :  { %v294_v59 = vsel %vm293_vm5, %v292_v58, 0.0 }
 0x456   :  { %295 = vst [vmem:[%s509_s2] sm:$0xff] %v294_v59 }

</bundles_post_ra>
